<compile_context>
chip_gen: v7x
topology: tpu7x:2x2x1
jax: 0.10.0
libtpu: 0.0.40
codegen_flags: <defaults>
</compile_context>

<pallas_src>
import functools

import jax
import jax.numpy as jnp
import numpy as np
from jax import lax
from jax.experimental import pallas as pl
from jax.experimental.pallas import tpu as pltpu


def _block_kernel(x_ref, w1_ref, b1_ref, wdw_ref, b2_ref, w3_ref, b3_ref,
                  m_ref, o_ref, *, W, L_pad, residual):
    f32 = jnp.float32
    x = x_ref[0]                                               # (C_in, L_pad) bf16

    # --- 1x1 expansion conv (MXU, bf16 in / f32 acc) + folded-BN bias + ReLU6
    y = jnp.dot(w1_ref[...], x, preferred_element_type=f32)    # (C_exp, L_pad) f32
    y = jnp.clip(y + b1_ref[...], 0.0, 6.0)

    # Host-precomputed boundary masks (identical for every grid step).
    m_left = m_ref[0:1, :]    # col >= 1    -> dj = -1 tap allowed
    m_right = m_ref[1:2, :]   # col <= W-2  -> dj = +1 tap allowed
    m_up = m_ref[2:3, :]      # row >= 1    -> di = -1 tap allowed
    m_down = m_ref[3:4, :]    # row <= H-2  -> di = +1 tap allowed
    m_valid = m_ref[4:5, :]   # non lane-pad pixel

    # --- 3x3 depthwise conv (stride 1, pad 1) via XLU lane-rolls ------------
    # roll(v, s)[p] == v[p - s]; negative offsets are written as L_pad - s so
    # every shift amount is non-negative.  Column masks are baked into the
    # shifted columns; wherever a row mask is 1 the row-shifted pixel sits in
    # the same column of the same image, so pre-masking is exact.
    y_l = m_left * pltpu.roll(y, 1, axis=1)                    # y[p-1]
    y_r = m_right * pltpu.roll(y, L_pad - 1, axis=1)           # y[p+1]

    wdw = wdw_ref[...]                                         # (C_exp, 9), BN folded
    # Horizontal combinations for each row offset di, evaluated at unshifted p;
    # tap index k = (di+1)*3 + (dj+1).
    u_m1 = wdw[:, 0:1] * y_l + wdw[:, 1:2] * y + wdw[:, 2:3] * y_r   # di = -1
    u_0 = wdw[:, 3:4] * y_l + wdw[:, 4:5] * y + wdw[:, 5:6] * y_r    # di =  0
    u_p1 = wdw[:, 6:7] * y_l + wdw[:, 7:8] * y + wdw[:, 8:9] * y_r   # di = +1
    acc = (u_0
           + m_up * pltpu.roll(u_m1, W, axis=1)                # u_m1[p - W]
           + m_down * pltpu.roll(u_p1, L_pad - W, axis=1))     # u_p1[p + W]
    acc = jnp.clip(acc + b2_ref[...], 0.0, 6.0)

    # --- 1x1 projection conv (MXU, bf16 in / f32 acc) + folded-BN bias ------
    z = jnp.dot(w3_ref[...], acc.astype(jnp.bfloat16),
                preferred_element_type=f32)                    # (C_out, L_pad)
    z = z + b3_ref[...]
    if residual:
        z = z + x.astype(f32)
    # Zero the lane-pad tail so the padded bf16 output is safe for a chained
    # consumer that keeps the (C, L_pad) layout.
    o_ref[0] = (z * m_valid).astype(o_ref.dtype)


class Block:
    """Pallas port of the MobileNetV2 inverted-residual Block (eval-mode BN)."""

    def __init__(self, c_in, i, t, c, n, s, *, key):
        self.i, self.n = i, n
        self.stride = s if i == n - 1 else 1
        self.c_in = c_in
        self.c_out = c if i == n - 1 else c_in
        self.c_exp = c_in * t
        self.residual = (i != n - 1)
        self.eps = 1e-5

        f32 = jnp.float32
        ks = jax.random.split(key, 6)
        # Conv weights in PyTorch shapes (OIHW), deterministic init.
        self.w1 = 0.3 * jax.random.normal(ks[0], (self.c_exp, c_in, 1, 1), f32)
        self.wdw = 0.3 * jax.random.normal(ks[1], (self.c_exp, 1, 3, 3), f32)
        self.w3 = 0.3 * jax.random.normal(ks[2], (self.c_out, self.c_exp, 1, 1), f32)

        def bn(k, ch):
            k1, k2, k3, k4 = jax.random.split(k, 4)
            gamma = 1.0 + 0.1 * jax.random.normal(k1, (ch,), f32)
            beta = 0.1 * jax.random.normal(k2, (ch,), f32)
            mean = 0.1 * jax.random.normal(k3, (ch,), f32)
            var = jax.random.uniform(k4, (ch,), f32, minval=0.5, maxval=1.5)
            return gamma, beta, mean, var

        self.bn1 = bn(ks[3], self.c_exp)
        self.bn2 = bn(ks[4], self.c_exp)
        self.bn3 = bn(ks[5], self.c_out)

        def fold(p):
            g, b, m, v = p
            scale = g / jnp.sqrt(v + self.eps)
            bias = b - m * scale
            return scale[:, None], bias[:, None]

        self.s1, self.b1 = fold(self.bn1)
        self.s2, self.b2 = fold(self.bn2)
        self.s3, self.b3 = fold(self.bn3)

        # Fold BN scales into the conv weights (one-time, host side).
        self.w1_eff = (self.w1[:, :, 0, 0] * self.s1).astype(jnp.bfloat16)   # (C_exp, C_in)
        self.wdw_eff = self.wdw[:, 0].reshape(self.c_exp, 9) * self.s2       # (C_exp, 9), f32
        self.w3_eff = (self.w3[:, :, 0, 0] * self.s3).astype(jnp.bfloat16)   # (C_out, C_exp)

    @staticmethod
    def _make_masks(H, W, L_pad):
        """(5, L_pad) f32: [col>=1, col<=W-2, row>=1, row<=H-2, valid]."""
        L = H * W
        p = np.arange(L_pad)
        valid = p < L
        col = p % W
        row = p // W
        m_left = valid & (col >= 1)
        m_right = valid & (col <= W - 2)
        m_up = valid & (row >= 1)
        m_down = valid & (row <= H - 2)
        return jnp.asarray(
            np.stack([m_left, m_right, m_up, m_down, valid]).astype(np.float32))

    def _vmem_limit_bytes(self, L_pad):
        bf16, f32 = 2, 4
        blk_in = 2 * self.c_in * L_pad * bf16       # double-buffered bf16 input block
        blk_out = 2 * self.c_out * L_pad * bf16     # double-buffered bf16 output block
        params = ((self.c_exp * self.c_in + self.c_out * self.c_exp) * bf16
                  + self.c_exp * 9 * f32
                  + (2 * self.c_exp + self.c_out) * f32
                  + 5 * L_pad * f32)
        live = 8 * self.c_exp * L_pad * f32         # y, y_l, y_r, u_*, acc, z
        need = blk_in + blk_out + params + live
        # Leave headroom under v7x's 64 MiB per-core VMEM while staying above
        # the smaller scoped defaults on v5e/v6e.
        return int(min(max(2 * need + (16 << 20), 32 << 20), 48 << 20))

    def __call__(self, x):
        N, C_in, H, W = x.shape
        assert C_in == self.c_in
        L = H * W
        L_pad = ((L + 127) // 128) * 128             # lane-dense layout

        # TODO(synk): in a chained deployment keep activations in this padded
        # bf16 (N, C, L_pad) layout between blocks so this cast/pad pass (and
        # the final un-pad / f32 cast below) disappears.
        x2 = x.reshape(N, C_in, L)
        if L_pad != L:
            x2 = jnp.pad(x2, ((0, 0), (0, 0), (0, L_pad - L)))
        x2 = x2.astype(jnp.bfloat16)

        masks = self._make_masks(H, W, L_pad)        # (5, L_pad) f32 constants

        kernel = functools.partial(_block_kernel, W=W, L_pad=L_pad,
                                   residual=self.residual)
        out2 = pl.pallas_call(
            kernel,
            out_shape=jax.ShapeDtypeStruct((N, self.c_out, L_pad), jnp.bfloat16),
            grid=(N,),
            in_specs=[
                pl.BlockSpec((1, C_in, L_pad), lambda b: (b, 0, 0)),
                pl.BlockSpec((self.c_exp, C_in), lambda b: (0, 0)),
                pl.BlockSpec((self.c_exp, 1), lambda b: (0, 0)),
                pl.BlockSpec((self.c_exp, 9), lambda b: (0, 0)),
                pl.BlockSpec((self.c_exp, 1), lambda b: (0, 0)),
                pl.BlockSpec((self.c_out, self.c_exp), lambda b: (0, 0)),
                pl.BlockSpec((self.c_out, 1), lambda b: (0, 0)),
                pl.BlockSpec((5, L_pad), lambda b: (0, 0)),
            ],
            out_specs=pl.BlockSpec((1, self.c_out, L_pad), lambda b: (b, 0, 0)),
            compiler_params=pltpu.CompilerParams(
                dimension_semantics=("parallel",),
                vmem_limit_bytes=self._vmem_limit_bytes(L_pad)),
        )(x2, self.w1_eff, self.b1, self.wdw_eff, self.b2, self.w3_eff,
          self.b3, masks)

        out = out2[:, :, :L].reshape(N, self.c_out, H, W).astype(jnp.float32)
        if self.stride > 1:
            # Exact: stride-s depthwise conv == stride-1 conv then subsample,
            # and every later op in the block is per-pixel.
            out = out[:, :, ::self.stride, ::self.stride]
        return out

    # Pure-JAX reference (same eval-mode BN semantics) for validation.
    def reference(self, x):
        dn = ("NCHW", "OIHW", "NCHW")
        prec = lax.Precision.HIGHEST

        def bn(y, p):
            g, b, m, v = p
            inv = (g / jnp.sqrt(v + self.eps))[None, :, None, None]
            return (y - m[None, :, None, None]) * inv + b[None, :, None, None]

        y = lax.conv_general_dilated(x, self.w1, (1, 1), "VALID",
                                     dimension_numbers=dn, precision=prec)
        y = jnp.clip(bn(y, self.bn1), 0.0, 6.0)
        y = lax.conv_general_dilated(y, self.wdw, (self.stride, self.stride),
                                     ((1, 1), (1, 1)),
                                     feature_group_count=self.c_exp,
                                     dimension_numbers=dn, precision=prec)
        y = jnp.clip(bn(y, self.bn2), 0.0, 6.0)
        y = lax.conv_general_dilated(y, self.w3, (1, 1), "VALID",
                                     dimension_numbers=dn, precision=prec)
        y = bn(y, self.bn3)
        if self.residual:
            y = y + x
        return y


if __name__ == "__main__":
    key = jax.random.PRNGKey(0)
    k_param, k_x = jax.random.split(key)

    # Block(c_in=4, i=0, t=2, c=8, n=2, s=2): since i != n-1, stride is forced
    # to 1, output channels == c_in, and the residual connection is applied.
    blk = Block(c_in=4, i=0, t=2, c=8, n=2, s=2, key=k_param)
    x = jax.random.normal(k_x, (2, 4, 16, 16), jnp.float32)

    out = jax.block_until_ready(blk(x))
    ref = blk.reference(x)
    assert out.shape == ref.shape == (2, 4, 16, 16)
    max_err = float(jnp.max(jnp.abs(out - ref)))
    # Tolerance accounts for bf16 MXU inputs (f32 accumulation) and the bf16
    # kernel output writeback.
    if not jnp.allclose(out, ref, atol=7.5e-2, rtol=7.5e-2):
        raise AssertionError(f"Pallas output mismatch vs reference, max abs err = {max_err}")
    print("KERNEL_OK")
</pallas_src>

<mosaic_0001>
module attributes {stable_mosaic.version = 11 : i64} {
  func.func @_block_kernel(%arg0: i32, %arg1: memref<1x4x256xbf16, #tpu.memory_space<vmem>>, %arg2: memref<8x4xbf16, #tpu.memory_space<vmem>>, %arg3: memref<8x1xf32, #tpu.memory_space<vmem>>, %arg4: memref<8x9xf32, #tpu.memory_space<vmem>>, %arg5: memref<8x1xf32, #tpu.memory_space<vmem>>, %arg6: memref<4x8xbf16, #tpu.memory_space<vmem>>, %arg7: memref<4x1xf32, #tpu.memory_space<vmem>>, %arg8: memref<5x256xf32, #tpu.memory_space<vmem>>, %arg9: memref<1x4x256xbf16, #tpu.memory_space<vmem>>) attributes {dimension_semantics = [#tpu.dimension_semantics<parallel>], iteration_bounds = array<i64: 2>, scalar_prefetch = 0 : i64, scratch_operands = 0 : i64, tpu.core_type = #tpu.core_type<tc>, window_params = [{transform_indices = @transform_0, window_bounds = array<i64: 1, 4, 256>}, {pipeline_mode = #tpu.pipeline_mode<synchronous>, transform_indices = @transform_1, window_bounds = array<i64: 8, 4>}, {pipeline_mode = #tpu.pipeline_mode<synchronous>, transform_indices = @transform_2, window_bounds = array<i64: 8, 1>}, {pipeline_mode = #tpu.pipeline_mode<synchronous>, transform_indices = @transform_3, window_bounds = array<i64: 8, 9>}, {pipeline_mode = #tpu.pipeline_mode<synchronous>, transform_indices = @transform_4, window_bounds = array<i64: 8, 1>}, {pipeline_mode = #tpu.pipeline_mode<synchronous>, transform_indices = @transform_5, window_bounds = array<i64: 4, 8>}, {pipeline_mode = #tpu.pipeline_mode<synchronous>, transform_indices = @transform_6, window_bounds = array<i64: 4, 1>}, {pipeline_mode = #tpu.pipeline_mode<synchronous>, transform_indices = @transform_7, window_bounds = array<i64: 5, 256>}, {transform_indices = @transform_8, window_bounds = array<i64: 1, 4, 256>}]} {
    %c0 = arith.constant 0 : index
    %c0_0 = arith.constant 0 : index
    %c0_1 = arith.constant 0 : index
    %0 = vector.load %arg1[%c0, %c0_0, %c0_1] : memref<1x4x256xbf16, #tpu.memory_space<vmem>>, vector<1x4x256xbf16>
    %1 = vector.shape_cast %0 : vector<1x4x256xbf16> to vector<4x256xbf16>
    %c0_2 = arith.constant 0 : index
    %c0_3 = arith.constant 0 : index
    %2 = vector.load %arg2[%c0_2, %c0_3] : memref<8x4xbf16, #tpu.memory_space<vmem>>, vector<8x4xbf16>
    %cst = arith.constant dense<0.000000e+00> : vector<8x256xf32>
    %3 = tpu.matmul %2, %1, %cst {dimension_numbers = #tpu.dot_dimension_numbers<[1], [0], [0], [1], [0, 0, 1, 1], [], []>} : vector<8x4xbf16>, vector<4x256xbf16>, vector<8x256xf32> -> vector<8x256xf32>
    %c0_4 = arith.constant 0 : index
    %c0_5 = arith.constant 0 : index
    %4 = vector.load %arg3[%c0_4, %c0_5] : memref<8x1xf32, #tpu.memory_space<vmem>>, vector<8x1xf32>
    %5 = vector.broadcast %4 : vector<8x1xf32> to vector<8x256xf32>
    %6 = arith.addf %3, %5 : vector<8x256xf32>
    %cst_6 = arith.constant 0.000000e+00 : f32
    %cst_7 = arith.constant 6.000000e+00 : f32
    %7 = vector.broadcast %cst_6 : f32 to vector<8x256xf32>
    %8 = arith.maximumf %7, %6 : vector<8x256xf32>
    %9 = vector.broadcast %cst_7 : f32 to vector<8x256xf32>
    %10 = arith.minimumf %9, %8 : vector<8x256xf32>
    %c0_8 = arith.constant 0 : index
    %c0_9 = arith.constant 0 : index
    %11 = vector.load %arg8[%c0_8, %c0_9] : memref<5x256xf32, #tpu.memory_space<vmem>>, vector<1x256xf32>
    %c1 = arith.constant 1 : index
    %c0_10 = arith.constant 0 : index
    %12 = vector.load %arg8[%c1, %c0_10] : memref<5x256xf32, #tpu.memory_space<vmem>>, vector<1x256xf32>
    %c2 = arith.constant 2 : index
    %c0_11 = arith.constant 0 : index
    %13 = vector.load %arg8[%c2, %c0_11] : memref<5x256xf32, #tpu.memory_space<vmem>>, vector<1x256xf32>
    %c3 = arith.constant 3 : index
    %c0_12 = arith.constant 0 : index
    %14 = vector.load %arg8[%c3, %c0_12] : memref<5x256xf32, #tpu.memory_space<vmem>>, vector<1x256xf32>
    %c4 = arith.constant 4 : index
    %c0_13 = arith.constant 0 : index
    %15 = vector.load %arg8[%c4, %c0_13] : memref<5x256xf32, #tpu.memory_space<vmem>>, vector<1x256xf32>
    %c1_i32 = arith.constant 1 : i32
    %16 = tpu.dynamic_rotate %10 by %c1_i32 dim 1 : vector<8x256xf32>, i32 -> vector<8x256xf32>
    %17 = vector.broadcast %11 : vector<1x256xf32> to vector<8x256xf32>
    %18 = arith.mulf %17, %16 : vector<8x256xf32>
    %c255_i32 = arith.constant 255 : i32
    %19 = tpu.dynamic_rotate %10 by %c255_i32 dim 1 : vector<8x256xf32>, i32 -> vector<8x256xf32>
    %20 = vector.broadcast %12 : vector<1x256xf32> to vector<8x256xf32>
    %21 = arith.mulf %20, %19 : vector<8x256xf32>
    %c0_14 = arith.constant 0 : index
    %c0_15 = arith.constant 0 : index
    %22 = vector.load %arg4[%c0_14, %c0_15] : memref<8x9xf32, #tpu.memory_space<vmem>>, vector<8x9xf32>
    %23 = vector.extract_strided_slice %22 {offsets = [0, 0], sizes = [8, 1], strides = [1, 1]} : vector<8x9xf32> to vector<8x1xf32>
    %24 = vector.broadcast %23 : vector<8x1xf32> to vector<8x256xf32>
    %25 = arith.mulf %24, %18 : vector<8x256xf32>
    %26 = vector.extract_strided_slice %22 {offsets = [0, 1], sizes = [8, 1], strides = [1, 1]} : vector<8x9xf32> to vector<8x1xf32>
    %27 = vector.broadcast %26 : vector<8x1xf32> to vector<8x256xf32>
    %28 = arith.mulf %27, %10 : vector<8x256xf32>
    %29 = arith.addf %25, %28 : vector<8x256xf32>
    %30 = vector.extract_strided_slice %22 {offsets = [0, 2], sizes = [8, 1], strides = [1, 1]} : vector<8x9xf32> to vector<8x1xf32>
    %31 = vector.broadcast %30 : vector<8x1xf32> to vector<8x256xf32>
    %32 = arith.mulf %31, %21 : vector<8x256xf32>
    %33 = arith.addf %29, %32 : vector<8x256xf32>
    %34 = vector.extract_strided_slice %22 {offsets = [0, 3], sizes = [8, 1], strides = [1, 1]} : vector<8x9xf32> to vector<8x1xf32>
    %35 = vector.broadcast %34 : vector<8x1xf32> to vector<8x256xf32>
    %36 = arith.mulf %35, %18 : vector<8x256xf32>
    %37 = vector.extract_strided_slice %22 {offsets = [0, 4], sizes = [8, 1], strides = [1, 1]} : vector<8x9xf32> to vector<8x1xf32>
    %38 = vector.broadcast %37 : vector<8x1xf32> to vector<8x256xf32>
    %39 = arith.mulf %38, %10 : vector<8x256xf32>
    %40 = arith.addf %36, %39 : vector<8x256xf32>
    %41 = vector.extract_strided_slice %22 {offsets = [0, 5], sizes = [8, 1], strides = [1, 1]} : vector<8x9xf32> to vector<8x1xf32>
    %42 = vector.broadcast %41 : vector<8x1xf32> to vector<8x256xf32>
    %43 = arith.mulf %42, %21 : vector<8x256xf32>
    %44 = arith.addf %40, %43 : vector<8x256xf32>
    %45 = vector.extract_strided_slice %22 {offsets = [0, 6], sizes = [8, 1], strides = [1, 1]} : vector<8x9xf32> to vector<8x1xf32>
    %46 = vector.broadcast %45 : vector<8x1xf32> to vector<8x256xf32>
    %47 = arith.mulf %46, %18 : vector<8x256xf32>
    %48 = vector.extract_strided_slice %22 {offsets = [0, 7], sizes = [8, 1], strides = [1, 1]} : vector<8x9xf32> to vector<8x1xf32>
    %49 = vector.broadcast %48 : vector<8x1xf32> to vector<8x256xf32>
    %50 = arith.mulf %49, %10 : vector<8x256xf32>
    %51 = arith.addf %47, %50 : vector<8x256xf32>
    %52 = vector.extract_strided_slice %22 {offsets = [0, 8], sizes = [8, 1], strides = [1, 1]} : vector<8x9xf32> to vector<8x1xf32>
    %53 = vector.broadcast %52 : vector<8x1xf32> to vector<8x256xf32>
    %54 = arith.mulf %53, %21 : vector<8x256xf32>
    %55 = arith.addf %51, %54 : vector<8x256xf32>
    %c16_i32 = arith.constant 16 : i32
    %56 = tpu.dynamic_rotate %33 by %c16_i32 dim 1 : vector<8x256xf32>, i32 -> vector<8x256xf32>
    %57 = vector.broadcast %13 : vector<1x256xf32> to vector<8x256xf32>
    %58 = arith.mulf %57, %56 : vector<8x256xf32>
    %59 = arith.addf %44, %58 : vector<8x256xf32>
    %c240_i32 = arith.constant 240 : i32
    %60 = tpu.dynamic_rotate %55 by %c240_i32 dim 1 : vector<8x256xf32>, i32 -> vector<8x256xf32>
    %61 = vector.broadcast %14 : vector<1x256xf32> to vector<8x256xf32>
    %62 = arith.mulf %61, %60 : vector<8x256xf32>
    %63 = arith.addf %59, %62 : vector<8x256xf32>
    %c0_16 = arith.constant 0 : index
    %c0_17 = arith.constant 0 : index
    %64 = vector.load %arg5[%c0_16, %c0_17] : memref<8x1xf32, #tpu.memory_space<vmem>>, vector<8x1xf32>
    %65 = vector.broadcast %64 : vector<8x1xf32> to vector<8x256xf32>
    %66 = arith.addf %63, %65 : vector<8x256xf32>
    %cst_18 = arith.constant 0.000000e+00 : f32
    %cst_19 = arith.constant 6.000000e+00 : f32
    %67 = vector.broadcast %cst_18 : f32 to vector<8x256xf32>
    %68 = arith.maximumf %67, %66 : vector<8x256xf32>
    %69 = vector.broadcast %cst_19 : f32 to vector<8x256xf32>
    %70 = arith.minimumf %69, %68 : vector<8x256xf32>
    %c0_20 = arith.constant 0 : index
    %c0_21 = arith.constant 0 : index
    %71 = vector.load %arg6[%c0_20, %c0_21] : memref<4x8xbf16, #tpu.memory_space<vmem>>, vector<4x8xbf16>
    %72 = arith.truncf %70 : vector<8x256xf32> to vector<8x256xbf16>
    %cst_22 = arith.constant dense<0.000000e+00> : vector<4x256xf32>
    %73 = tpu.matmul %71, %72, %cst_22 {dimension_numbers = #tpu.dot_dimension_numbers<[1], [0], [0], [1], [0, 0, 1, 1], [], []>} : vector<4x8xbf16>, vector<8x256xbf16>, vector<4x256xf32> -> vector<4x256xf32>
    %c0_23 = arith.constant 0 : index
    %c0_24 = arith.constant 0 : index
    %74 = vector.load %arg7[%c0_23, %c0_24] : memref<4x1xf32, #tpu.memory_space<vmem>>, vector<4x1xf32>
    %75 = vector.broadcast %74 : vector<4x1xf32> to vector<4x256xf32>
    %76 = arith.addf %73, %75 : vector<4x256xf32>
    %77 = arith.extf %1 : vector<4x256xbf16> to vector<4x256xf32>
    %78 = arith.addf %76, %77 : vector<4x256xf32>
    %79 = vector.broadcast %15 : vector<1x256xf32> to vector<4x256xf32>
    %80 = arith.mulf %78, %79 : vector<4x256xf32>
    %81 = arith.truncf %80 : vector<4x256xf32> to vector<4x256xbf16>
    %c0_25 = arith.constant 0 : index
    %c0_26 = arith.constant 0 : index
    %c0_27 = arith.constant 0 : index
    %82 = vector.load %arg9[%c0_25, %c0_26, %c0_27] : memref<1x4x256xbf16, #tpu.memory_space<vmem>>, vector<1x4x256xbf16>
    %83 = vector.shape_cast %82 : vector<1x4x256xbf16> to vector<4x256xbf16>
    %84 = vector.shape_cast %81 : vector<4x256xbf16> to vector<1x4x256xbf16>
    tpu.vector_store %arg9[%c0_25, %c0_26, %c0_27], %84 {strides = array<i32>} : memref<1x4x256xbf16, #tpu.memory_space<vmem>>, vector<1x4x256xbf16>,
    return
  }
  func.func @transform_0(%arg0: i32) -> (i32, i32, i32) {
    %c0_i32 = arith.constant 0 : i32
    %c0_i32_0 = arith.constant 0 : i32
    %c0_i32_1 = arith.constant 0 : i32
    return %arg0, %c0_i32, %c0_i32_0 : i32, i32, i32
  }
  func.func @transform_1(%arg0: i32) -> (i32, i32) {
    %c0_i32 = arith.constant 0 : i32
    %c0_i32_0 = arith.constant 0 : i32
    %c0_i32_1 = arith.constant 0 : i32
    return %c0_i32, %c0_i32_0 : i32, i32
  }
  func.func @transform_2(%arg0: i32) -> (i32, i32) {
    %c0_i32 = arith.constant 0 : i32
    %c0_i32_0 = arith.constant 0 : i32
    %c0_i32_1 = arith.constant 0 : i32
    return %c0_i32, %c0_i32_0 : i32, i32
  }
  func.func @transform_3(%arg0: i32) -> (i32, i32) {
    %c0_i32 = arith.constant 0 : i32
    %c0_i32_0 = arith.constant 0 : i32
    %c0_i32_1 = arith.constant 0 : i32
    return %c0_i32, %c0_i32_0 : i32, i32
  }
  func.func @transform_4(%arg0: i32) -> (i32, i32) {
    %c0_i32 = arith.constant 0 : i32
    %c0_i32_0 = arith.constant 0 : i32
    %c0_i32_1 = arith.constant 0 : i32
    return %c0_i32, %c0_i32_0 : i32, i32
  }
  func.func @transform_5(%arg0: i32) -> (i32, i32) {
    %c0_i32 = arith.constant 0 : i32
    %c0_i32_0 = arith.constant 0 : i32
    %c0_i32_1 = arith.constant 0 : i32
    return %c0_i32, %c0_i32_0 : i32, i32
  }
  func.func @transform_6(%arg0: i32) -> (i32, i32) {
    %c0_i32 = arith.constant 0 : i32
    %c0_i32_0 = arith.constant 0 : i32
    %c0_i32_1 = arith.constant 0 : i32
    return %c0_i32, %c0_i32_0 : i32, i32
  }
  func.func @transform_7(%arg0: i32) -> (i32, i32) {
    %c0_i32 = arith.constant 0 : i32
    %c0_i32_0 = arith.constant 0 : i32
    %c0_i32_1 = arith.constant 0 : i32
    return %c0_i32, %c0_i32_0 : i32, i32
  }
  func.func @transform_8(%arg0: i32) -> (i32, i32, i32) {
    %c0_i32 = arith.constant 0 : i32
    %c0_i32_0 = arith.constant 0 : i32
    %c0_i32_1 = arith.constant 0 : i32
    return %arg0, %c0_i32, %c0_i32_0 : i32, i32, i32
  }
}

</mosaic_0001>

<bundles_post_ra>
// kernel: tpu_custom_call.1
= control target key start
LH: loop header
LB: loop body
LE: loop exit
PB: predicated region body
PF: predicated region fallthrough
CT: control target
= control target key end

     0   :  { %13 = vsyncpa [#allocation3], 0  ;;  %s1125_s0 = inlined_call_operand.vmem [shape: bf16[2,4,256], index: 0, kind: input, shape index: {}]   ;;  %s1126_s1 = inlined_call_operand.vmem [shape: bf16[8,4], index: 1, kind: input, shape index: {}]   ;;  %s1127_s2 = inlined_call_operand.vmem [shape: f32[8,1], index: 2, kind: input, shape index: {}]   ;;  %s1128_s3 = inlined_call_operand.vmem [shape: f32[8,9], index: 3, kind: input, shape index: {}]   ;;  %s1129_s4 = inlined_call_operand.vmem [shape: f32[8,1], index: 4, kind: input, shape index: {}]   ;;  %s1130_s5 = inlined_call_operand.vmem [shape: bf16[4,8], index: 5, kind: input, shape index: {}]   ;;  %s1131_s6 = inlined_call_operand.vmem [shape: f32[4,1], index: 6, kind: input, shape index: {}]   ;;  %s1132_s7 = inlined_call_operand.vmem [shape: f32[5,256], index: 7, kind: input, shape index: {}]   ;;  %s1133_s8 = inlined_call_operand.hbm [shape: bf16[2,4,256], index: 8, kind: output, shape index: {}]  }
   0x1   :  { %15 = vsyncpa [#allocation3 + $0x1], 0  ;;  %s932_s27 = smov 0   ;;  %s934_s28 = smov 0  }
   0x2   :  { %s936_s29 = smov 0   ;;  %s938_s30 = smov 0  }
   0x3 LB: > { %s953_s9 = sadd.s32 4294967295, %s870_s30   ;;  %s721_s10 = sadd.s32 4294967294, %s870_s30   ;;  %s870_s30 = sphi %s938_s30, %s1139_s30   ;;  %s866_s29 = sphi %s936_s29, %s1138_s29   ;;  %s862_s28 = sphi %s934_s28, %s1137_s28   ;;  %s858_s27 = sphi %s932_s27, %s1136_s27  }
   0x4   : > { %s957_s11 = sadd.s32 1, %s870_s30   ;;  %s201_s12 = sadd.s32 1, %s866_s29 }
   0x5   : > { %s198_s13 = ssub.s32 %s870_s30, %s957_s11  ;;  %p211_p0 = scmp.ne.s32.totalorder %s866_s29, %s862_s28 }
   0x6   : > { %p199_p1 = scmp.eq.s32.totalorder %s198_s13, 0  ;;  %p212_p2 = scmp.eq.s32.totalorder %s953_s9, 1 }
   0x7   : > { %p217_p3 = scmp.ne.s32.totalorder %s862_s28, %s858_s27  ;;  %p218_p4 = scmp.eq.s32.totalorder %s721_s10, 1 }
   0x8   : > { %s968_s14 = scalar_select %p199_p1, %s866_s29, %s201_s12  }
   0x9   : > { %p970_p5 = por %p212_p2, %p211_p0  ;;  %p974_p6 = por %p218_p4, %p217_p3 }
   0xa   : > { %p724_p7 = scmp.ge.s32.totalorder %s870_s30, 1  ;;  %p265_p8 = scmp.lt.s32.totalorder %s870_s30, 3 }
   0xc   : > { %p266_p9 = pnand %p724_p7, %p265_p8 }
   0xd   : > { %p299_p10 = scmp.lt.s32.totalorder (!%p266_p9), %s953_s9, 1  ;;  %v317_v0 = vlaneseq (!%p266_p9)  ;;  %v984_v1 = vld [vmem:[%s1128_s3] sm:$0xff] (!%p266_p9)  ;;  %v872_v2 = vmov (!%p266_p9), 1983009808   ;;  %v873_v4 = vmov (!%p266_p9), 0   ;;  %v874_v7 = vmov (!%p266_p9), 1  }
   0xe   : > { %269 = sbr.rel (%p266_p9) target bundleno = 758 (0x2f6), region = 52  ;;  %v315_v3 = vunpack.c.l.s4 (!%p266_p9), %v872_v2  ;;  %365 = vmatprep.mubr.bf16.mxu0 (!%p266_p9), %v873_v4  ;;  %798 = vset.pattern.permute.xlu0 (!%p266_p9), %v873_v4  ;;  %v307_v5 = vld [vmem:[%s1127_s2] sm:$0xff] (!%p266_p9)  ;;  %vm326_vm0 = vcmask (!%p266_p9), 1041408   ;;  %v875_v12 = vmov (!%p266_p9), 2   ;;  %v876_v15 = vmov (!%p266_p9), 6   ;;  %s881_s12 = smov (!%p266_p9), 1  }
   0xf   : > { %v993_v6 = vshrl.u32 (!%p266_p9), %v317_v0, 7  ;;  %799 = vset.pattern.permute.xlu1 (!%p266_p9), %v874_v7  ;;  %310 = vperm.xlu0 (!%p266_p9), %798, %v307_v5   ;;  %v306_v16 = vld [vmem:[%s1126_s1] sm:$0xf] (!%p266_p9)  ;;  %vm322_vm1 = vcmask (!%p266_p9), 31744   ;;  %v877_v17 = vmov (!%p266_p9), 7   ;;  %v878_v18 = vmov (!%p266_p9), 8  }
  0x10   : > { %v316_v8 = vunpack.c.0.s8 (!%p266_p9), %v315_v3  ;;  %438 = vperm.xlu1 (!%p266_p9), %799, %v984_v1   ;;  %605 = vmatprep.mubr.bf16.mxu1 (!%p266_p9), %v873_v4  ;;  %v879_v19 = vmov (!%p266_p9), 4   ;;  %v880_v20 = vmov (!%p266_p9), 3   ;;  %s882_s13 = smov (!%p266_p9), 127   ;;  %v883_v32 = vmov (!%p266_p9), 5   ;;  %s885_s24 = smov (!%p266_p9), 112  }
  0x11   : > { %v1025_v38 = vsub.s32 (!%p266_p9), 0, %v993_v6  ;;  %v1028_v39 = vsub.s32 (!%p266_p9), 1, %v993_v6  ;;  %v1031_v41 = vand.u32 (!%p266_p9), 127, %v317_v0  ;;  %v378_v42 = vld [vmem:[%s1132_s7] ss:$8 sm:$0x3] (!%p266_p9) }
  0x12   : > { %v319_v9 = vsub.s32 (!%p266_p9), %v316_v8, %v993_v6  ;;  %v730_v46 = vld [vmem:[%s1132_s7 + $0x1] ss:$8 sm:$0x3] (!%p266_p9)  ;;  %vm566_vm6 = vcmask (!%p266_p9), 1043456   ;;  %vm562_vm7 = vcmask (!%p266_p9), 64512   ;;  %s296_s20 = sand.u32 (!%p266_p9), 1, %s862_s28  }
  0x13   : > { %432 = vperm.xlu0 (!%p266_p9), %798, %v984_v1   ;;  %vm393_vm2 = vcmp.lt.s32.totalorder (!%p266_p9), %v1031_v41, 1  ;;  %v400_v43 = vrot.slane (!%p266_p9), %v378_v42, %v1025_v38  ;;  %v404_v44 = vrot.slane (!%p266_p9), %v378_v42, %v1028_v39  ;;  %vm413_vm3 = vcmp.lt.s32.totalorder (!%p266_p9), %v1031_v41, 127  ;;  %s725_s23 = sshll.u32 (!%p266_p9), %s296_s20, 2  ;;  %s648_s17 = scalar_lea.sflag (!%p266_p9), [#allocation3], %s296_s20 }
  0x14   : > { %800 = vset.pattern.permute.xlu1 (!%p266_p9), %v875_v12  ;;  %v420_v52 = vrot.slane (!%p266_p9), %v730_v46, %v1025_v38  ;;  %v424_v53 = vrot.slane (!%p266_p9), %v730_v46, %v1028_v39  ;;  %v541_v12 = vld [vmem:[%s1129_s4] sm:$0xff] (!%p266_p9)  ;;  %vm501_vm4 = vcmp.lt.s32.totalorder (!%p266_p9), %v1031_v41, 16  ;;  %vm523_vm5 = vcmp.lt.s32.totalorder (!%p266_p9), %v1031_v41, 112 }
  0x15   : > { %s300_s21 = scalar_select %p299_p10, %s953_s9, 1  ;;  %446 = vperm.xlu1 %800, %v984_v1  }
  0x17   : > { %s743_s22 = sshll.u32 %s300_s21, 2  ;;  %801 = vset.pattern.permute.xlu0 %v876_v15  ;;  %s884_s21 = smov 16  }
  0x18   : > { %s303_s25 = scalar_lea.vmem %s1125_s0, %s743_s22  ;;  %476 = vperm.xlu0 %801, %v984_v1  }
  0x19   : > { %v1001_v10 = vld [vmem:[%s303_s25] sm:$0xf]  ;;  %802 = vset.pattern.permute.xlu1 %v877_v17  ;;  %s298_s25 = scalar_lea.vmem [#allocation2], %s725_s23 }
  0x1a   : > { %v320_v11 = vrot.slane %v1001_v10, %v319_v9  ;;  %482 = vperm.xlu1 %802, %v984_v1   ;;  %v556_v17 = vld [vmem:[%s1131_s6] sm:$0xf]  ;;  %s662_s26 = sshll.u32 %s298_s25, 4  ;;  %s1085_s26 = int_to_ptr.vmem [resolvable:$true] %s662_s26 }
  0x1b   : > { %s808_s18 = scalar_lea.vmem %s1085_s26, 64 }
  0x1c   : > { %v321_v13 = vcombine.high %v320_v11, %v320_v11  ;;  %v328_v14 = vsel %vm326_vm0, %v320_v11, 0  ;;  %804 = vset.pattern.permute.xlu0 %v880_v20  ;;  %p809_p11 = scmp.ne.s32.totalorder %s1085_s26, %s808_s18 }
  0x1e   : > { %728 = vmatprep.subr.msk.bf16.mxu0 %vm326_vm0, %v321_v13  ;;  %803 = vset.pattern.permute.xlu1 %v878_v18  ;;  %p810_p12 = pnand %p809_p11, %p970_p5 }
  0x1f   : > { %334 = vmatpush1.bf16.msra.mxu0 %v328_v14  ;;  %490 = vperm.xlu1 %803, %v984_v1  }
  0x20   : > { %p811_p13 = pneg %p810_p12 }
  0x22   : > { %729 = vmatmul.mubr.msk.bf16.vlgmr.msra.gmra.mrb[0].mxu0 %vm322_vm1, %v306_v16 }
  0x23   : > { %805 = vset.pattern.permute.xlu1 %v879_v19 }
  0x8e   : > { %v311_v21 = vpop.permute.xlu0 %310 }
  0x8f   : > { %v439_v33 = vpop.permute.xlu1 %438 }
  0x92   : > { %v433_v36 = vpop.permute.xlu0 %432 }
  0x94   : > { %v447_v34 = vpop.permute.xlu1 %446 }
  0x97   : > { %v477_v40 = vpop.permute.xlu0 %476 }
  0x99   : > { %v483_v35 = vpop.permute.xlu1 %482 }
  0x9e   : > { %v491_v37 = vpop.permute.xlu1 %490 }
  0xf5   : > { %v367_v22 = vpop.f32.mrb[0].mxu0 }
  0xf6   : > { %v368_v23 = vadd.f32 %v367_v22, %v311_v21  ;;  %v369_v24 = vpop.f32.mrb[1].mxu0 }
  0xf7   : > { %v370_v25 = vadd.f32 %v369_v24, %v311_v21  ;;  %v371_v26 = vpop.f32.mrb[2].mxu0 }
  0xf8   : > { %v374_v27 = vmax.f32 %v368_v23, 0.0  ;;  %v372_v28 = vpop.f32.mrb[3].mxu0 }
  0xf9   : > { %v375_v29 = vmax.f32 %v370_v25, 0.0 }
  0xfa   : > { %v1012_v30 = vmin.f32 %v374_v27, 6.0 }
  0xfb   : > { %v1014_v31 = vmin.f32 %v375_v29, 6.0 }
  0xfc   : > { %387 = vrot.lane.b32.xlu1 %v1012_v30, %s881_s12  ;;  %v441_v63 = vmul.f32 %v439_v33, %v1012_v30  ;;  %v485_v5 = vmul.f32 %v483_v35, %v1012_v30 }
  0xfd   : > { %389 = vrot.lane.b32.xlu0 %v1014_v31, %s881_s12  ;;  %v442_v62 = vmul.f32 %v439_v33, %v1014_v31  ;;  %v486_v13 = vmul.f32 %v483_v35, %v1014_v31  ;;  %v731_v35 = vld [vmem:[%s1132_s7 + $0x2] ss:$8 sm:$0x3] }
 0x100   : > { %411 = vrot.lane.b32.xlu1 %v1014_v31, %s882_s13 }
 0x101   : > { %409 = vrot.lane.b32.xlu0 %v1012_v30, %s882_s13 }
 0x104   : > { %460 = vperm.xlu1 %805, %v984_v1  }
 0x105   : > { %454 = vperm.xlu0 %804, %v984_v1  }
 0x108   : > { %806 = vset.pattern.permute.xlu1 %v883_v32 }
 0x109   : > { %468 = vperm.xlu1 %806, %v984_v1   ;;  %807 = vset.pattern.permute.xlu0 %v873_v4 }
 0x16e   : > { %v388_v45 = vpop.permute.xlu1 %387 }
 0x16f   : > { %v390_v47 = vpop.permute.xlu0 %389 }
 0x170   : > { %v394_v48 = vsel %vm393_vm2, %v388_v45, %v390_v47  ;;  %v395_v49 = vsel %vm393_vm2, %v390_v47, %v388_v45 }
 0x171   : > { %v407_v50 = vmul.f32 %v400_v43, %v395_v49  ;;  %v408_v51 = vmul.f32 %v404_v44, %v394_v48 }
 0x172   : > { %v412_v54 = vpop.permute.xlu1 %411 }
 0x173   : > { %v435_v55 = vmul.f32 %v433_v36, %v407_v50  ;;  %v436_v56 = vmul.f32 %v433_v36, %v408_v51  ;;  %v410_v57 = vpop.permute.xlu0 %409  ;;  %v479_v0 = vmul.f32 %v477_v40, %v407_v50  ;;  %v480_v9 = vmul.f32 %v477_v40, %v408_v51 }
 0x174   : > { %v414_v58 = vsel %vm413_vm3, %v410_v57, %v412_v54  ;;  %v415_v59 = vsel %vm413_vm3, %v412_v54, %v410_v57  ;;  %v512_v40 = vrot.slane %v731_v35, %v1028_v39 }
 0x175   : > { %v427_v60 = vmul.f32 %v420_v52, %v414_v58  ;;  %v428_v61 = vmul.f32 %v424_v53, %v415_v59  ;;  %v444_v1 = vadd.f32 %v442_v62, %v436_v56  ;;  %v443_v3 = vadd.f32 %v441_v63, %v435_v55 }
 0x176   : > { %v487_v11 = vadd.f32 %v485_v5, %v479_v0  ;;  %v488_v16 = vadd.f32 %v486_v13, %v480_v9 }
 0x177   : > { %v450_v2 = vmul.f32 %v447_v34, %v428_v61  ;;  %v449_v4 = vmul.f32 %v447_v34, %v427_v60  ;;  %v493_v8 = vmul.f32 %v491_v37, %v427_v60  ;;  %v494_v15 = vmul.f32 %v491_v37, %v428_v61 }
 0x178   : > { %v508_v37 = vrot.slane %v731_v35, %v1025_v38 }
 0x179   : > { %v452_v6 = vadd.f32 %v450_v2, %v444_v1  ;;  %v451_v7 = vadd.f32 %v449_v4, %v443_v3  ;;  %v495_v14 = vadd.f32 %v493_v8, %v487_v11  ;;  %v496_v18 = vadd.f32 %v494_v15, %v488_v16  ;;  %v553_v2 = vld [vmem:[%s1130_s5] sm:$0x3]  ;;  %v733_v4 = vld [vmem:[%s1132_s7 + $0x4] ss:$8 sm:$0x3] }
 0x17a   : > { %v614_v3 = vunpack.c.l.bf16 %v1001_v10  ;;  %v624_v9 = vrot.slane %v733_v4, %v1025_v38  ;;  %v628_v13 = vrot.slane %v733_v4, %v1028_v39 }
 0x17b   : > { %499 = vrot.lane.b32.xlu1 %v452_v6, %s884_s21  ;;  %497 = vrot.lane.b32.xlu0 %v451_v7, %s884_s21 }
 0x17c   : > { %v616_v7 = vcombine.high %v614_v3, %v614_v3 }
 0x17f   : > { %519 = vrot.lane.b32.xlu1 %v495_v14, %s885_s24  ;;  %544 = vperm.xlu0 %807, %v541_v12  }
 0x183   : > { %v461_v19 = vpop.permute.xlu1 %460  ;;  %521 = vrot.lane.b32.xlu1 %v496_v18, %s885_s24  ;;  %559 = vperm.xlu0 %807, %v556_v17   ;;  %s744_s24 = sshll.u32 %s953_s9, 6  ;;  %s886_s9 = smov [#allocation2]  }
 0x184   : > { %v455_v20 = vpop.permute.xlu0 %454  ;;  %v463_v21 = vmul.f32 %v461_v19, %v1012_v30  ;;  %v464_v22 = vmul.f32 %v461_v19, %v1014_v31  ;;  %v732_v31 = vld [vmem:[%s1132_s7 + $0x3] ss:$8 sm:$0x3]  ;;  %s1083_s13 = scalar_lea.hbm %s1133_s8, %s744_s24  ;;  %s812_s19 = sshll.u32 %s886_s9, 4  ;;  %s813_s19 = int_to_ptr.vmem [resolvable:$false] %s812_s19 }
 0x185   : > { %v457_v23 = vmul.f32 %v455_v20, %v407_v50  ;;  %v458_v24 = vmul.f32 %v455_v20, %v408_v51  ;;  %v530_v44 = vrot.slane %v732_v31, %v1025_v38  ;;  %v534_v45 = vrot.slane %v732_v31, %v1028_v39  ;;  %s814_s21 = scalar_lea.vmem %s813_s19, 128  ;;  %p815_p0 = scmp.lt.s32.totalorder %s1085_s26, %s813_s19 }
 0x186   : > { %p816_p1 = scmp.lt.s32.totalorder %s814_s21, %s808_s18 }
 0x187   : > { %v465_v26 = vadd.f32 %v463_v21, %v457_v23  ;;  %v466_v27 = vadd.f32 %v464_v22, %v458_v24 }
 0x188   : > { %v469_v25 = vpop.permute.xlu1 %468  ;;  %p817_p2 = por %p816_p1, %p815_p0 }
 0x189   : > { %v471_v28 = vmul.f32 %v469_v25, %v427_v60  ;;  %v472_v29 = vmul.f32 %v469_v25, %v428_v61 }
 0x18a   : > { %p818_p3 = pnand %p817_p2, %p811_p13 }
 0x18b   : > { %v473_v32 = vadd.f32 %v471_v28, %v465_v26  ;;  %v474_v33 = vadd.f32 %v472_v29, %v466_v27 }
 0x1ed   : > { %v500_v34 = vpop.permute.xlu1 %499  ;;  %v498_v36 = vpop.permute.xlu0 %497 }
 0x1ee   : > { %v502_v42 = vsel %vm501_vm4, %v498_v36, %v500_v34  ;;  %v503_v43 = vsel %vm501_vm4, %v500_v34, %v498_v36 }
 0x1ef   : > { %v515_v49 = vmul.f32 %v508_v37, %v503_v43  ;;  %v516_v50 = vmul.f32 %v512_v40, %v502_v42 }
 0x1f1   : > { %v520_v30 = vpop.permute.xlu1 %519  ;;  %v517_v53 = vadd.f32 %v515_v49, %v473_v32  ;;  %v518_v54 = vadd.f32 %v516_v50, %v474_v33 }
 0x1f5   : > { %v522_v46 = vpop.permute.xlu1 %521 }
 0x1f6   : > { %v524_v47 = vsel %vm523_vm5, %v520_v30, %v522_v46  ;;  %v525_v48 = vsel %vm523_vm5, %v522_v46, %v520_v30 }
 0x1f7   : > { %v537_v51 = vmul.f32 %v530_v44, %v524_v47  ;;  %v538_v52 = vmul.f32 %v534_v45, %v525_v48 }
 0x1f9   : > { %v539_v55 = vadd.f32 %v537_v51, %v517_v53  ;;  %v540_v56 = vadd.f32 %v538_v52, %v518_v54 }
 0x1fe   : > { %v545_v57 = vpop.permute.xlu0 %544 }
 0x1ff   : > { %v547_v58 = vadd.f32 %v545_v57, %v539_v55  ;;  %v548_v41 = vadd.f32 %v545_v57, %v540_v56 }
 0x201   : > { %v549_v59 = vmax.f32 %v547_v58, 0.0  ;;  %v550_v60 = vmax.f32 %v548_v41, 0.0 }
 0x202   : > { %v560_v5 = vpop.permute.xlu0 %559 }
 0x203   : > { %v551_v61 = vmin.f32 %v549_v59, 6.0  ;;  %v552_v62 = vmin.f32 %v550_v60, 6.0 }
 0x205   : > { %v555_v63 = vpack.c.bf16 %v552_v62, %v552_v62  ;;  %v554_v0 = vpack.c.bf16 %v551_v61, %v551_v61 }
 0x207   : > { %734 = vmatprep.subr.msk.bf16.mxu1 %vm566_vm6, %v555_v63  ;;  %v568_v1 = vsel %vm566_vm6, %v554_v0, 0 }
 0x208   : > { %574 = vmatpush1.bf16.msra.mxu1 %v568_v1 }
 0x20b   : > { %735 = vmatmul.mubr.msk.bf16.vlgmr.msra.gmra.mrb[0].mxu1 %vm562_vm7, %v553_v2 }
 0x2de   : > { %v607_v6 = vpop.f32.mrb[0].mxu1 }
 0x2df   : > { %v608_v8 = vadd.f32 %v607_v6, %v560_v5  ;;  %v609_v11 = vpop.f32.mrb[1].mxu1 }
 0x2e0   : > { %v610_v12 = vadd.f32 %v609_v11, %v560_v5  ;;  %v611_v14 = vpop.f32.mrb[2].mxu1 }
 0x2e1   : > { %v618_v10 = vadd.f32 %v614_v3, %v608_v8  ;;  %v612_v15 = vpop.f32.mrb[3].mxu1 }
 0x2e2   : > { %v619_v16 = vadd.f32 %v616_v7, %v610_v12 }
 0x2e3   : > { %v631_v17 = vmul.f32 %v624_v9, %v618_v10 }
 0x2e4   : > { %v632_v18 = vmul.f32 %v628_v13, %v619_v16 }
 0x2e6   : > { %v736_v19 = vpack.c.bf16 %v632_v18, %v631_v17 }
 0x2e8   : > { %737 = vst.sshfl [vmem:[%s298_s25] sm:$0x33 pattern:$0x76325410] %v736_v19 }
 0x2e9   : > { %821 = shalt.err (!%p818_p3)
}
 0x2ea   : > { %s822_s20 = scalar_lea.hbm %s1083_s13, 64  ;;  %s826_s24 = scalar_lea.hbm %s1133_s8, 128 }
 0x2eb   : > { %p823_p4 = scmp.ne.s32.totalorder %s1083_s13, %s822_s20  ;;  %p827_p9 = scmp.lt.u32.totalorder %s1083_s13, %s1133_s8 }
 0x2ec   : > { %p828_p10 = scmp.lt.u32.totalorder %s826_s24, %s822_s20  ;;  %p830_p12 = scmp.lt.u32.totalorder %s822_s20, %s1083_s13 }
 0x2ed   : > { %p824_p7 = pnand %p823_p4, %p970_p5 }
 0x2ee   : > { %p829_p11 = por %p828_p10, %p827_p9 }
 0x2ef   : > { %p825_p8 = pneg %p824_p7 }
 0x2f0   : > { %p831_p13 = por %p830_p12, %p829_p11 }
 0x2f2   : > { %p832_p0 = pnand %p831_p13, %p825_p8 }
 0x2f4   : > { %835 = shalt.err (!%p832_p0)
}
 0x2f5   : > { %745 = dma.vmem_to_hbm [thread:$0]  (%p970_p5), %s1085_s26, 64, %s1083_s13, %s648_s17  }
 0x2f6 PF: > { %p751_p1 = scmp.ge.s32.totalorder %s870_s30, 2  ;;  %s674_s12 = sand.u32 1, %s858_s27  }
 0x2f7   : > { %s675_s18 = scalar_lea.sflag [#allocation3], %s674_s12 }
 0x2f8   : > { %p748_p2 = pnand %p751_p1, %p974_p6 }
 0x2fa   : > { %853 = dma.done.wait (!%p748_p2), %s675_s18, 64  }
 0x2fb   : > { %855 = vsyncadd (!%p748_p2), %s675_s18, 4294967232  ;;  %p18_p3 = scmp.ge.s32.totalorder %s957_s11, 4   ;;  %s1136_s27 = smov %s862_s28 }
 0x2fc   : > { %s1137_s28 = smov %s866_s29  ;;  %s1138_s29 = smov %s968_s14 }
 0x2fd   : > { %s1139_s30 = smov %s957_s11  ;;  %20 = sbr.rel (!%p18_p3) target bundleno = 3 (0x3), region = 91 }
 0x304   :  { %680 = vsyncpa [#allocation3], 1 }
 0x305   :  { %682 = vsyncpa [#allocation3 + $0x1], 1 }

</bundles_post_ra>
